<compile_context>
chip_gen: v5e
topology: v5e:2x2
jax: 0.10.0
libtpu: 0.0.40
codegen_flags: <defaults>
</compile_context>

<pallas_src>
import jax
import jax.numpy as jnp
from jax.experimental import pallas as pl
from jax.experimental.pallas import tpu as pltpu


# Cap on the per-step tile size.  2 MiB already sits on the ~85% HBM-roofline
# plateau for copy-like kernels and keeps the double-buffered footprint
# (in + out, 2 buffers each = 4x) at 8 MiB -> safe on v5e/v6e/v7x defaults.
_MAX_TILE_BYTES = 2 * 1024 * 1024


def _identity_kernel(x_ref, o_ref):
    # Pure elementwise copy of the current lane-dense tile.
    o_ref[...] = x_ref[...]


def _copy_whole_array(xf: jax.Array) -> jax.Array:
    """Single-block copy (block_shape == full array dims, always legal)."""
    return pl.pallas_call(
        _identity_kernel,
        out_shape=jax.ShapeDtypeStruct(xf.shape, xf.dtype),
        in_specs=[pl.BlockSpec(xf.shape, lambda: (0,) * xf.ndim)],
        out_specs=pl.BlockSpec(xf.shape, lambda: (0,) * xf.ndim),
        input_output_aliases={0: 0},
        cost_estimate=pl.CostEstimate(
            flops=0, transcendentals=0, bytes_accessed=2 * xf.size * xf.dtype.itemsize
        ),
    )(xf)


def identity(x: jax.Array) -> jax.Array:
    """Identity forward pass via a Pallas TPU kernel. Accepts any shape."""
    orig_shape = x.shape
    total = x.size
    if total == 0:
        return x

    itemsize = x.dtype.itemsize

    # Pick the widest lane-dense last dim (multiple of 128) that divides the
    # flattened size, preferring >= 1024 lanes for unmasked full-width stores.
    lane = None
    for cand in (2048, 1024, 512, 256, 128):
        if total % cand == 0:
            lane = cand
            break

    if lane is None:
        # Size not a multiple of 128: fall back to a single whole-array block.
        y = _copy_whole_array(x.reshape(1, total))
        return y.reshape(orig_shape)

    rows = total // lane
    xf = x.reshape(rows, lane)

    # Sublane granularity depends on dtype packing (32-bit: 8, bf16: 16, i8: 32).
    sublane = {1: 32, 2: 16}.get(itemsize, 8)
    max_tile_rows = max(sublane, _MAX_TILE_BYTES // (lane * itemsize))

    if rows <= max_tile_rows:
        # Whole array fits in one tile (block == full array dims, always legal).
        y = _copy_whole_array(xf)
        return y.reshape(orig_shape)

    # Largest sublane-aligned divisor of `rows` not exceeding the tile cap.
    tile_rows = None
    cand = sublane
    while cand <= max_tile_rows:
        if rows % cand == 0:
            tile_rows = cand
        cand += sublane
    if tile_rows is None:
        # No aligned divisor (rows not a multiple of the sublane count):
        # degrade gracefully to one whole-array block.
        y = _copy_whole_array(xf)
        return y.reshape(orig_shape)

    grid = (rows // tile_rows,)
    y = pl.pallas_call(
        _identity_kernel,
        out_shape=jax.ShapeDtypeStruct((rows, lane), x.dtype),
        grid_spec=pltpu.PrefetchScalarGridSpec(
            num_scalar_prefetch=0,
            grid=grid,
            in_specs=[pl.BlockSpec((tile_rows, lane), lambda i: (i, 0))],
            out_specs=pl.BlockSpec((tile_rows, lane), lambda i: (i, 0)),
        ),
        compiler_params=pltpu.CompilerParams(
            # Single flattened axis is embarrassingly parallel -> shards
            # across both TensorCores on v7x; neutral on v5e/v6e.
            dimension_semantics=("parallel",),
        ),
        input_output_aliases={0: 0},
        cost_estimate=pl.CostEstimate(
            flops=0, transcendentals=0, bytes_accessed=2 * total * itemsize
        ),
    )(xf)
    return y.reshape(orig_shape)


if __name__ == "__main__":
    key = jax.random.PRNGKey(0)
    x = jax.random.normal(key, (2, 4, 16, 16), dtype=jnp.float32)

    y = identity(x)
    jax.block_until_ready(y)

    assert y.shape == x.shape
    assert y.dtype == x.dtype
    assert bool(jnp.all(y == x))

    print("KERNEL_OK")
</pallas_src>

<mosaic_0001>
module attributes {stable_mosaic.version = 11 : i64} {
  func.func @_identity_kernel(%arg0: memref<1x2048xf32, #tpu.memory_space<vmem>>, %arg1: memref<1x2048xf32, #tpu.memory_space<vmem>>) attributes {dimension_semantics = [], scalar_prefetch = 0 : i64, scratch_operands = 0 : i64, tpu.core_type = #tpu.core_type<tc>} {
    %c0 = arith.constant 0 : index
    %c0_0 = arith.constant 0 : index
    %0 = vector.load %arg0[%c0, %c0_0] : memref<1x2048xf32, #tpu.memory_space<vmem>>, vector<1x2048xf32>
    %c0_1 = arith.constant 0 : index
    %c0_2 = arith.constant 0 : index
    %1 = vector.load %arg1[%c0_1, %c0_2] : memref<1x2048xf32, #tpu.memory_space<vmem>>, vector<1x2048xf32>
    tpu.vector_store %arg1[%c0_1, %c0_2], %0 {strides = array<i32>} : memref<1x2048xf32, #tpu.memory_space<vmem>>, vector<1x2048xf32>,
    return
  }
}

</mosaic_0001>

<bundles_post_ra>
// kernel: tpu_custom_call.1
= control target key start
LH: loop header
LB: loop body
LE: loop exit
PB: predicated region body
PF: predicated region fallthrough
CT: control target
= control target key end

     0   :  { %6 = vsyncpa [#allocation3], 0  ;;  %s116_s0 = inlined_call_operand.hbm [shape: f32[1,2048], index: 0, kind: input, shape index: {}, may-alias: {0,1}]   ;;  %s117_s1 = inlined_call_operand.hbm [shape: f32[1,2048], index: 1, kind: output, shape index: {}, may-alias: {0,1}]  }
   0x1   :  { %7 = vsyncpa [#allocation4], 0  ;;  %s13_s8 = sshll.u32 %s116_s0, 4  ;;  %s98_s9 = smov [#allocation2]   ;;  %s14_s8 = int_to_ptr.hbm [resolvable:$true] %s13_s8 }
   0x2   :  { %s15_s10 = sshll.u32 %s98_s9, 4  ;;  %s16_s10 = int_to_ptr.vmem [resolvable:$true] %s15_s10 }
   0x3   :  { %18 = dma.hbm_to_vmem [thread:$0]  %s14_s8, 256, %s16_s10, [#allocation3]  }
   0x4   :  { %94 = dma.done.wait [#allocation3], 256  }
   0x5   :  { %95 = vsyncadd [#allocation3], 4294967040  ;;  %s99_s11 = smov [#allocation5]   ;;  %s34_s15 = sshll.u32 %s117_s1, 4  ;;  %v23_v0 = vld [vmem:[#allocation2] sm:$0xff]  ;;  %v24_v1 = vld [vmem:[#allocation2 + $0x8] sm:$0xff]  ;;  %s35_s15 = int_to_ptr.hbm [resolvable:$true] %s34_s15 }
   0x6   :  { %s32_s12 = sshll.u32 %s99_s11, 4  ;;  %25 = vst [vmem:[#allocation5] sm:$0xff] %v23_v0  ;;  %s33_s12 = int_to_ptr.vmem [resolvable:$true] %s32_s12 }
   0x7   :  { %26 = vst [vmem:[#allocation5 + $0x8] sm:$0xff] %v24_v1 }
   0x8   :  { %37 = dma.vmem_to_hbm [thread:$0]  %s33_s12, 256, %s35_s15, [#allocation4]  }
   0x9   :  { %96 = dma.done.wait [#allocation4], 256  }
   0xa   :  { %97 = vsyncadd [#allocation4], 4294967040 }
   0xb   :  { %42 = vsyncpa [#allocation3], 1 }
   0xc   :  { %43 = vsyncpa [#allocation4], 1 }

</bundles_post_ra>
